<compile_context>
chip_gen: v7x
topology: tpu7x:2x2x1
jax: 0.10.0
libtpu: 0.0.40
codegen_flags: <defaults>
</compile_context>

<pallas_src>
import numpy as np
import jax
import jax.numpy as jnp
from jax.experimental import pallas as pl
from jax.experimental.pallas import tpu as pltpu


SLAB = 128  # lane-dense output slab width (stage widths 24+24+48 = 96 <= 128)


# -----------------------------------------------------------------------------
# Skeleton / graph glue (plain Python / numpy — parameter construction only)
# -----------------------------------------------------------------------------
def find_neighbor(parents, dist):
    """neighbor_list[i] = joints within graph distance `dist` of joint i."""
    J = len(parents)
    D = np.full((J, J), 1e9, dtype=np.float64)
    for i in range(J):
        D[i, i] = 0.0
    for i, p in enumerate(parents):
        if p >= 0:
            D[i, p] = D[p, i] = 1.0
    for k in range(J):  # Floyd–Warshall (tiny J)
        for i in range(J):
            for j in range(J):
                if D[i, k] + D[k, j] < D[i, j]:
                    D[i, j] = D[i, k] + D[k, j]
    neighbor_list = [[j for j in range(J) if D[i, j] <= dist] for i in range(J)]
    return neighbor_list, D


def build_skeleton_linear(key, neighbor_list, in_channels, out_channels):
    """Masked linear: weight (out,in), mask (out,in), bias (out,)."""
    J = len(neighbor_list)
    in_per = in_channels // J
    out_per = out_channels // J
    mask = np.zeros((out_channels, in_channels), dtype=np.float32)
    for j, neigh in enumerate(neighbor_list):
        expanded = [k * in_per + c for k in neigh for c in range(in_per)]
        mask[j * out_per:(j + 1) * out_per, expanded] = 1.0
    kw, kb = jax.random.split(key)
    w = jax.random.normal(kw, (out_channels, in_channels), jnp.float32)
    w = w * (1.0 / np.sqrt(in_channels))
    b = 0.01 * jax.random.normal(kb, (out_channels,), jnp.float32)
    return w, jnp.asarray(mask), b


def build_skeleton_pool(parents, channels_per_edge):
    """Merge consecutive joint pairs; returns averaging matrix P and new parents."""
    J = len(parents)
    groups, i = [], 0
    while i < J:
        groups.append([i, i + 1] if i + 1 < J else [i])
        i += len(groups[-1])
    old_to_new = {j: gi for gi, g in enumerate(groups) for j in g}
    new_parents = []
    for gi, g in enumerate(groups):
        p = parents[g[0]]
        if p < 0:
            new_parents.append(-1)
        else:
            npar = old_to_new[p]
            new_parents.append(-1 if npar == gi else npar)
    P = np.zeros((len(groups) * channels_per_edge, J * channels_per_edge),
                 dtype=np.float32)
    for gi, g in enumerate(groups):
        for j in g:
            for c in range(channels_per_edge):
                P[gi * channels_per_edge + c, j * channels_per_edge + c] = 1.0 / len(g)
    return jnp.asarray(P), new_parents


# -----------------------------------------------------------------------------
# Parameter build: raw (for the reference) + pre-folded slab weights (kernel)
# -----------------------------------------------------------------------------
def build_static_encoder_params(parents, neighbor_distance, seed=0):
    """Raw per-stage params [(w, mask, b, P)], mirroring StaticEncoder.__init__."""
    key = jax.random.PRNGKey(seed)
    channels = 3
    layer_parents = list(parents)
    number_layers = 3
    params = []
    for i in range(number_layers):
        neighbor_list, _ = find_neighbor(layer_parents, neighbor_distance)
        J = len(neighbor_list)
        in_c = channels * J
        out_c = channels * 2 * J
        key, sub = jax.random.split(key)
        w, mask, b = build_skeleton_linear(sub, neighbor_list, in_c, out_c)
        if i < number_layers - 1:
            P, layer_parents = build_skeleton_pool(layer_parents, channels * 2)
        else:
            P = jnp.eye(out_c, dtype=jnp.float32)   # last stage: no pool
        params.append((w, mask, b, P))
        channels *= 2
    return params


def fold_static_encoder_params(raw_params, slab=SLAB, weight_dtype=jnp.bfloat16):
    """Fold mask + pool + layout into lane-dense slab weights (done ONCE).

    Stage i output occupies slab columns offs[i]:offs[i+1]; stage i>0 reads
    its input from slab columns offs[i-1]:offs[i].  Everything else is 0, so
    slab = leaky(x@W1+b1) + leaky(a1@W2+b2) + leaky(a2@W3+b3) places every
    stage at its own columns (leaky(0)=0) with no masked lane stores.
    Weights are cast to bf16 here (MXU-native); biases stay f32 in one (3,SLAB).
    """
    widths = [int(P.shape[0]) for (_, _, _, P) in raw_params]   # Cpool per stage
    offs = np.cumsum([0] + widths).tolist()
    assert offs[-1] <= slab, "stage outputs do not fit the 128-lane slab"

    weights = []
    b_all = jnp.zeros((len(raw_params), slab), jnp.float32)
    for i, (w, mask, b, P) in enumerate(raw_params):
        w_eff = (w * mask).T @ P.T          # (Cin_i, Cpool_i)  — mask+pool folded
        b_eff = b @ P.T                     # (Cpool_i,)
        cin_i, cp_i = w_eff.shape
        if i == 0:
            ws = jnp.zeros((cin_i, slab), jnp.float32)
            ws = ws.at[:, offs[0]:offs[0] + cp_i].set(w_eff)
        else:
            ws = jnp.zeros((slab, slab), jnp.float32)
            ws = ws.at[offs[i - 1]:offs[i - 1] + cin_i,
                       offs[i]:offs[i] + cp_i].set(w_eff)
        weights.append(ws.astype(weight_dtype))
        b_all = b_all.at[i, offs[i]:offs[i] + cp_i].set(b_eff)
    return tuple(weights), b_all, offs


# -----------------------------------------------------------------------------
# Fused Pallas kernel: 3 × (bf16 matmul + f32 bias + LeakyReLU(0.2)) in one call
# -----------------------------------------------------------------------------
def _fused_encoder_kernel(x_ref, w1_ref, w2_ref, w3_ref, b_ref, o_ref):
    x = x_ref[...]                               # (TB, Cin) bf16
    b = b_ref[...]                               # (3, SLAB) f32
    a1 = jnp.dot(x, w1_ref[...], preferred_element_type=jnp.float32) + b[0:1, :]
    a1 = jnp.maximum(a1, 0.2 * a1)               # LeakyReLU(0.2): single VPU max
    a2 = jnp.dot(a1.astype(w2_ref.dtype), w2_ref[...],
                 preferred_element_type=jnp.float32) + b[1:2, :]
    a2 = jnp.maximum(a2, 0.2 * a2)
    acc = a1 + a2                                # free a1 before the stage-3 dot
    a3 = jnp.dot(a2.astype(w3_ref.dtype), w3_ref[...],
                 preferred_element_type=jnp.float32) + b[2:3, :]
    a3 = jnp.maximum(a3, 0.2 * a3)
    # Disjoint non-zero column ranges + leaky(0)=0 ⇒ the sum is exact placement.
    o_ref[...] = (acc + a3).astype(o_ref.dtype)


def _round_up(x, m):
    return ((x + m - 1) // m) * m


def _pick_batch_tile(B):
    # Small batches: single full-extent block (legal for any B, grid of 1).
    # Large batches: >=4 grid steps (v7x megacore), <=4096 rows, multiple of 16
    # (bf16 sublane packing); the last ragged tile is masked on store.
    if B <= 1024:
        return B
    return max(16, min(4096, _round_up(pl.cdiv(B, 4), 16)))


def static_encoder_forward(x, folded_w, b_all, *, out_dtype=jnp.float32,
                           batch_tile=None):
    """Returns (flat_input_f32, slab) where slab[:, offs[i]:offs[i+1]] = stage i."""
    B0 = x.shape[0]
    xf = x.reshape(B0, -1).astype(jnp.float32)   # output[0] of the module
    w1, w2, w3 = folded_w
    xb = xf.astype(w1.dtype)                     # one wrapper-side bf16 cast
    Cin = xb.shape[1]
    slab = w1.shape[1]

    TB = batch_tile if batch_tile is not None else _pick_batch_tile(B0)
    grid = (pl.cdiv(B0, TB),)                    # ragged last tile handled by Pallas

    wbytes = jnp.dtype(w1.dtype).itemsize
    obytes = jnp.dtype(out_dtype).itemsize
    cost = pl.CostEstimate(
        flops=2 * B0 * slab * (Cin + 2 * slab),
        transcendentals=0,
        bytes_accessed=(B0 * Cin * wbytes + B0 * slab * obytes
                        + (Cin * slab + 2 * slab * slab) * wbytes
                        + b_all.size * 4),
    )

    slab_out = pl.pallas_call(
        _fused_encoder_kernel,
        out_shape=jax.ShapeDtypeStruct((B0, slab), out_dtype),
        grid_spec=pltpu.PrefetchScalarGridSpec(
            num_scalar_prefetch=0,
            grid=grid,
            in_specs=[
                pl.BlockSpec((TB, Cin), lambda i: (i, 0)),         # activations
                pl.BlockSpec((Cin, slab), lambda i: (0, 0)),       # stage-1 W
                pl.BlockSpec((slab, slab), lambda i: (0, 0)),      # stage-2 W
                pl.BlockSpec((slab, slab), lambda i: (0, 0)),      # stage-3 W
                pl.BlockSpec((b_all.shape[0], slab), lambda i: (0, 0)),  # biases
            ],
            out_specs=pl.BlockSpec((TB, slab), lambda i: (i, 0)),
        ),
        compiler_params=pltpu.CompilerParams(
            dimension_semantics=("parallel",)),
        cost_estimate=cost,
    )(xb, w1, w2, w3, b_all)

    return xf, slab_out


def split_encoder_outputs(xf, slab_out, offs):
    """Materialize the module's [input, out1, out2, out3] list (use only when
    separate per-stage tensors are actually needed; prefer consuming the slab)."""
    return [xf] + [slab_out[:, offs[i]:offs[i + 1]].astype(jnp.float32)
                   for i in range(len(offs) - 1)]


# -----------------------------------------------------------------------------
# Pure-JAX references for validation
# -----------------------------------------------------------------------------
def static_encoder_reference(x, raw_params):
    """Un-folded f32 reference mirroring the PyTorch module."""
    x = x.reshape(x.shape[0], -1)
    outputs = [x]
    for (w, mask, b, P) in raw_params:
        y = x @ (w * mask).T + b
        z = y @ P.T
        x = jnp.where(z >= 0.0, z, 0.2 * z)
        outputs.append(x)
    return outputs


def static_encoder_slab_reference(x, folded_w, b_all):
    """Plain-XLA version of the exact math the kernel does (same bf16 casts)."""
    w1, w2, w3 = folded_w
    a = x.reshape(x.shape[0], -1).astype(w1.dtype)
    a1 = jnp.dot(a, w1, preferred_element_type=jnp.float32) + b_all[0:1]
    a1 = jnp.maximum(a1, 0.2 * a1)
    a2 = jnp.dot(a1.astype(w2.dtype), w2, preferred_element_type=jnp.float32) + b_all[1:2]
    a2 = jnp.maximum(a2, 0.2 * a2)
    a3 = jnp.dot(a2.astype(w3.dtype), w3, preferred_element_type=jnp.float32) + b_all[2:3]
    a3 = jnp.maximum(a3, 0.2 * a3)
    return a1 + a2 + a3


if __name__ == "__main__":
    # Small synthetic skeleton: chain of 8 joints, 3 channels each.
    parents = [-1, 0, 1, 2, 3, 4, 5, 6]
    param = {"neighbor_distance": 2}
    B, J, C = 2, len(parents), 3

    key = jax.random.PRNGKey(0)
    x = jax.random.normal(key, (B, J, C), jnp.float32)   # PyTorch input (B, J, 3)

    raw_params = build_static_encoder_params(parents, param["neighbor_distance"],
                                             seed=0)
    folded_w, b_all, offs = fold_static_encoder_params(raw_params)

    xf, slab_out = static_encoder_forward(x, folded_w, b_all)
    slab_out = jax.block_until_ready(slab_out)

    # 1) Tight check: Pallas kernel vs identical-math XLA reference (same bf16
    #    operands, f32 accumulation) — validates the kernel/tiling itself.
    slab_ref = static_encoder_slab_reference(x, folded_w, b_all)
    np.testing.assert_allclose(np.asarray(slab_out), np.asarray(slab_ref),
                               rtol=1e-3, atol=1e-3)

    # 2) Semantics check vs the un-folded f32 module reference; tolerance
    #    reflects bf16 operand quantization accumulated across three stages.
    outs = split_encoder_outputs(xf, slab_out, offs)
    refs = static_encoder_reference(x, raw_params)
    for o, r in zip(outs, refs):
        np.testing.assert_allclose(np.asarray(o), np.asarray(r),
                                   rtol=5e-2, atol=5e-2)

    # 3) Exercise the ragged / multi-step-grid path (no jnp.pad anymore):
    #    B=20 rows with a forced 16-row tile -> grid of 2, last tile masked.
    x2 = jax.random.normal(jax.random.PRNGKey(1), (20, J, C), jnp.float32)
    _, slab2 = static_encoder_forward(x2, folded_w, b_all, batch_tile=16)
    slab2 = jax.block_until_ready(slab2)
    np.testing.assert_allclose(np.asarray(slab2),
                               np.asarray(static_encoder_slab_reference(
                                   x2, folded_w, b_all)),
                               rtol=1e-3, atol=1e-3)

    print("KERNEL_OK")
</pallas_src>

<mosaic_0001>
module attributes {stable_mosaic.version = 11 : i64} {
  func.func @_fused_encoder_kernel(%arg0: i32, %arg1: memref<2x24xbf16, #tpu.memory_space<vmem>>, %arg2: memref<24x128xbf16, #tpu.memory_space<vmem>>, %arg3: memref<128x128xbf16, #tpu.memory_space<vmem>>, %arg4: memref<128x128xbf16, #tpu.memory_space<vmem>>, %arg5: memref<3x128xf32, #tpu.memory_space<vmem>>, %arg6: memref<2x128xf32, #tpu.memory_space<vmem>>) attributes {dimension_semantics = [#tpu.dimension_semantics<parallel>], iteration_bounds = array<i64: 1>, scalar_prefetch = 0 : i64, scratch_operands = 0 : i64, tpu.core_type = #tpu.core_type<tc>, window_params = [{transform_indices = @transform_0, window_bounds = array<i64: 2, 24>}, {pipeline_mode = #tpu.pipeline_mode<synchronous>, transform_indices = @transform_1, window_bounds = array<i64: 24, 128>}, {pipeline_mode = #tpu.pipeline_mode<synchronous>, transform_indices = @transform_2, window_bounds = array<i64: 128, 128>}, {pipeline_mode = #tpu.pipeline_mode<synchronous>, transform_indices = @transform_3, window_bounds = array<i64: 128, 128>}, {pipeline_mode = #tpu.pipeline_mode<synchronous>, transform_indices = @transform_4, window_bounds = array<i64: 3, 128>}, {transform_indices = @transform_5, window_bounds = array<i64: 2, 128>}]} {
    %c0 = arith.constant 0 : index
    %c0_0 = arith.constant 0 : index
    %0 = vector.load %arg1[%c0, %c0_0] : memref<2x24xbf16, #tpu.memory_space<vmem>>, vector<2x24xbf16>
    %c0_1 = arith.constant 0 : index
    %c0_2 = arith.constant 0 : index
    %1 = vector.load %arg5[%c0_1, %c0_2] : memref<3x128xf32, #tpu.memory_space<vmem>>, vector<3x128xf32>
    %c0_3 = arith.constant 0 : index
    %c0_4 = arith.constant 0 : index
    %2 = vector.load %arg2[%c0_3, %c0_4] : memref<24x128xbf16, #tpu.memory_space<vmem>>, vector<24x128xbf16>
    %cst = arith.constant dense<0.000000e+00> : vector<2x128xf32>
    %3 = tpu.matmul %0, %2, %cst {dimension_numbers = #tpu.dot_dimension_numbers<[1], [0], [0], [1], [0, 0, 1, 1], [], []>} : vector<2x24xbf16>, vector<24x128xbf16>, vector<2x128xf32> -> vector<2x128xf32>
    %4 = vector.extract_strided_slice %1 {offsets = [0, 0], sizes = [1, 128], strides = [1, 1]} : vector<3x128xf32> to vector<1x128xf32>
    %5 = vector.broadcast %4 : vector<1x128xf32> to vector<2x128xf32>
    %6 = arith.addf %3, %5 : vector<2x128xf32>
    %cst_5 = arith.constant 2.000000e-01 : f32
    %7 = vector.broadcast %cst_5 : f32 to vector<2x128xf32>
    %8 = arith.mulf %7, %6 : vector<2x128xf32>
    %9 = arith.maximumf %6, %8 : vector<2x128xf32>
    %10 = arith.truncf %9 : vector<2x128xf32> to vector<2x128xbf16>
    %c0_6 = arith.constant 0 : index
    %c0_7 = arith.constant 0 : index
    %11 = vector.load %arg3[%c0_6, %c0_7] : memref<128x128xbf16, #tpu.memory_space<vmem>>, vector<128x128xbf16>
    %cst_8 = arith.constant dense<0.000000e+00> : vector<2x128xf32>
    %12 = tpu.matmul %10, %11, %cst_8 {dimension_numbers = #tpu.dot_dimension_numbers<[1], [0], [0], [1], [0, 0, 1, 1], [], []>} : vector<2x128xbf16>, vector<128x128xbf16>, vector<2x128xf32> -> vector<2x128xf32>
    %13 = vector.extract_strided_slice %1 {offsets = [1, 0], sizes = [1, 128], strides = [1, 1]} : vector<3x128xf32> to vector<1x128xf32>
    %14 = vector.broadcast %13 : vector<1x128xf32> to vector<2x128xf32>
    %15 = arith.addf %12, %14 : vector<2x128xf32>
    %cst_9 = arith.constant 2.000000e-01 : f32
    %16 = vector.broadcast %cst_9 : f32 to vector<2x128xf32>
    %17 = arith.mulf %16, %15 : vector<2x128xf32>
    %18 = arith.maximumf %15, %17 : vector<2x128xf32>
    %19 = arith.addf %9, %18 : vector<2x128xf32>
    %20 = arith.truncf %18 : vector<2x128xf32> to vector<2x128xbf16>
    %c0_10 = arith.constant 0 : index
    %c0_11 = arith.constant 0 : index
    %21 = vector.load %arg4[%c0_10, %c0_11] : memref<128x128xbf16, #tpu.memory_space<vmem>>, vector<128x128xbf16>
    %cst_12 = arith.constant dense<0.000000e+00> : vector<2x128xf32>
    %22 = tpu.matmul %20, %21, %cst_12 {dimension_numbers = #tpu.dot_dimension_numbers<[1], [0], [0], [1], [0, 0, 1, 1], [], []>} : vector<2x128xbf16>, vector<128x128xbf16>, vector<2x128xf32> -> vector<2x128xf32>
    %23 = vector.extract_strided_slice %1 {offsets = [2, 0], sizes = [1, 128], strides = [1, 1]} : vector<3x128xf32> to vector<1x128xf32>
    %24 = vector.broadcast %23 : vector<1x128xf32> to vector<2x128xf32>
    %25 = arith.addf %22, %24 : vector<2x128xf32>
    %cst_13 = arith.constant 2.000000e-01 : f32
    %26 = vector.broadcast %cst_13 : f32 to vector<2x128xf32>
    %27 = arith.mulf %26, %25 : vector<2x128xf32>
    %28 = arith.maximumf %25, %27 : vector<2x128xf32>
    %29 = arith.addf %19, %28 : vector<2x128xf32>
    %c0_14 = arith.constant 0 : index
    %c0_15 = arith.constant 0 : index
    %30 = vector.load %arg6[%c0_14, %c0_15] : memref<2x128xf32, #tpu.memory_space<vmem>>, vector<2x128xf32>
    tpu.vector_store %arg6[%c0_14, %c0_15], %29 {strides = array<i32>} : memref<2x128xf32, #tpu.memory_space<vmem>>, vector<2x128xf32>,
    return
  }
  func.func @transform_0(%arg0: i32) -> (i32, i32) {
    %c0_i32 = arith.constant 0 : i32
    %c0_i32_0 = arith.constant 0 : i32
    return %arg0, %c0_i32 : i32, i32
  }
  func.func @transform_1(%arg0: i32) -> (i32, i32) {
    %c0_i32 = arith.constant 0 : i32
    %c0_i32_0 = arith.constant 0 : i32
    %c0_i32_1 = arith.constant 0 : i32
    return %c0_i32, %c0_i32_0 : i32, i32
  }
  func.func @transform_2(%arg0: i32) -> (i32, i32) {
    %c0_i32 = arith.constant 0 : i32
    %c0_i32_0 = arith.constant 0 : i32
    %c0_i32_1 = arith.constant 0 : i32
    return %c0_i32, %c0_i32_0 : i32, i32
  }
  func.func @transform_3(%arg0: i32) -> (i32, i32) {
    %c0_i32 = arith.constant 0 : i32
    %c0_i32_0 = arith.constant 0 : i32
    %c0_i32_1 = arith.constant 0 : i32
    return %c0_i32, %c0_i32_0 : i32, i32
  }
  func.func @transform_4(%arg0: i32) -> (i32, i32) {
    %c0_i32 = arith.constant 0 : i32
    %c0_i32_0 = arith.constant 0 : i32
    %c0_i32_1 = arith.constant 0 : i32
    return %c0_i32, %c0_i32_0 : i32, i32
  }
  func.func @transform_5(%arg0: i32) -> (i32, i32) {
    %c0_i32 = arith.constant 0 : i32
    %c0_i32_0 = arith.constant 0 : i32
    return %arg0, %c0_i32 : i32, i32
  }
}

</mosaic_0001>

<bundles_post_ra>
// kernel: tpu_custom_call.1
= control target key start
LH: loop header
LB: loop body
LE: loop exit
PB: predicated region body
PF: predicated region fallthrough
CT: control target
= control target key end

     0   :  { %10 = vsyncpa [#allocation3], 0  ;;  %s753_s0 = inlined_call_operand.hbm [shape: bf16[2,24], index: 0, kind: input, shape index: {}]   ;;  %s754_s1 = inlined_call_operand.hbm [shape: bf16[24,128], index: 1, kind: input, shape index: {}]   ;;  %s755_s2 = inlined_call_operand.hbm [shape: bf16[128,128], index: 2, kind: input, shape index: {}]   ;;  %s756_s3 = inlined_call_operand.hbm [shape: bf16[128,128], index: 3, kind: input, shape index: {}]   ;;  %s757_s4 = inlined_call_operand.vmem [shape: f32[3,128], index: 4, kind: input, shape index: {}]   ;;  %s758_s5 = inlined_call_operand.hbm [shape: f32[2,128], index: 5, kind: output, shape index: {}]  }
   0x1   :  { %11 = vsyncpa [#allocation6], 0 }
   0x2   :  { %12 = vsyncpa [#allocation9], 0 }
   0x3   :  { %13 = vsyncpa [#allocation4], 0  ;;  %s618_s18 = smov [#allocation5]   ;;  %s500_s22 = scalar_lea.hbm %s754_s1, 192 }
   0x4   :  { %s29_s19 = sshll.u32 %s618_s18, 4  ;;  %p501_p0 = scmp.ne.s32.totalorder %s754_s1, %s500_s22  ;;  %s30_s19 = int_to_ptr.vmem [resolvable:$true] %s29_s19 }
   0x5   :  { %p504_p1 = scmp.lt.u32.totalorder %s500_s22, %s754_s1 }
   0x7   :  { %p506_p2 = pnand %p504_p1, %p501_p0 }
   0x9   :  { %509 = shalt.err (!%p506_p2)
}
   0xa   :  { %s510_s27 = scalar_lea.vmem %s30_s19, 192  ;;  %p515_p4 = scmp.lt.s32.totalorder %s30_s19, %s30_s19 }
   0xb   :  { %p511_p3 = scmp.ne.s32.totalorder %s30_s19, %s510_s27  ;;  %p516_p5 = scmp.lt.s32.totalorder %s510_s27, %s510_s27 }
   0xd   :  { %p517_p6 = por %p516_p5, %p515_p4 }
   0xf   :  { %p518_p7 = pnand %p517_p6, %p511_p3 }
  0x11   :  { %521 = shalt.err (!%p518_p7)
}
  0x12   :  { %s619_s28 = smov 64   ;;  %s620_s29 = smov 4  }
  0x13   :  { %35 = dma.hbm_to_vmem [thread:$0]  %s754_s1, 192, %s30_s19, [#allocation6], %s619_s28, %s619_s28, %s620_s29  }
  0x14   :  { %s621_s7 = smov [#allocation2]   ;;  %s622_s9 = smov [#allocation7]  }
  0x15   :  { %s20_s8 = sshll.u32 %s621_s7, 4  ;;  %s41_s10 = sshll.u32 %s622_s9, 4  ;;  %s21_s8 = int_to_ptr.vmem [resolvable:$true] %s20_s8  ;;  %s42_s10 = int_to_ptr.vmem [resolvable:$true] %s41_s10 }
  0x16   :  { %s522_s13 = scalar_lea.hbm %s753_s0, 16 }
  0x17   :  { %p523_p8 = scmp.ne.s32.totalorder %s753_s0, %s522_s13  ;;  %p526_p9 = scmp.lt.u32.totalorder %s522_s13, %s753_s0 }
  0x19   :  { %p528_p10 = pnand %p526_p9, %p523_p8 }
  0x1b   :  { %531 = shalt.err (!%p528_p10)
}
  0x1c   :  { %s532_s1 = scalar_lea.vmem %s21_s8, 16  ;;  %s536_s18 = scalar_lea.vmem %s21_s8, 32 }
  0x1d   :  { %p533_p11 = scmp.ne.s32.totalorder %s21_s8, %s532_s1  ;;  %p537_p12 = scmp.lt.s32.totalorder %s21_s8, %s21_s8 }
  0x1e   :  { %p538_p13 = scmp.lt.s32.totalorder %s536_s18, %s532_s1 }
  0x20   :  { %p539_p0 = por %p538_p13, %p537_p12 }
  0x22   :  { %p540_p1 = pnand %p539_p0, %p533_p11 }
  0x24   :  { %543 = shalt.err (!%p540_p1)
}
  0x25   :  { %23 = dma.hbm_to_vmem [thread:$0]  %s753_s0, 16, %s21_s8, [#allocation3]  }
  0x26   :  { %s544_s23 = scalar_lea.hbm %s755_s2, 1024 }
  0x27   :  { %p545_p2 = scmp.ne.s32.totalorder %s755_s2, %s544_s23  ;;  %p548_p3 = scmp.lt.u32.totalorder %s544_s23, %s755_s2 }
  0x29   :  { %p550_p4 = pnand %p548_p3, %p545_p2 }
  0x2b   :  { %553 = shalt.err (!%p550_p4)
}
  0x2c   :  { %s554_s30 = scalar_lea.vmem %s42_s10, 1024  ;;  %p559_p6 = scmp.lt.s32.totalorder %s42_s10, %s42_s10 }
  0x2d   :  { %p555_p5 = scmp.ne.s32.totalorder %s42_s10, %s554_s30  ;;  %p560_p7 = scmp.lt.s32.totalorder %s554_s30, %s554_s30 }
  0x2f   :  { %p561_p8 = por %p560_p7, %p559_p6 }
  0x31   :  { %p562_p9 = pnand %p561_p8, %p555_p5 }
  0x33   :  { %565 = shalt.err (!%p562_p9)
}
  0x34   :  { %47 = dma.hbm_to_vmem [thread:$0]  %s755_s2, 1024, %s42_s10, [#allocation6], %s619_s28, %s619_s28, %s620_s29  }
  0x35   :  { %s623_s7 = smov [#allocation8]   ;;  %s566_s12 = scalar_lea.hbm %s756_s3, 1024 }
  0x36   :  { %s53_s8 = sshll.u32 %s623_s7, 4  ;;  %p567_p10 = scmp.ne.s32.totalorder %s756_s3, %s566_s12  ;;  %s54_s8 = int_to_ptr.vmem [resolvable:$true] %s53_s8 }
  0x37   :  { %p570_p11 = scmp.lt.u32.totalorder %s566_s12, %s756_s3 }
  0x39   :  { %p572_p12 = pnand %p570_p11, %p567_p10 }
  0x3b   :  { %575 = shalt.err (!%p572_p12)
}
  0x3c   :  { %s576_s17 = scalar_lea.vmem %s54_s8, 1024  ;;  %p581_p0 = scmp.lt.s32.totalorder %s54_s8, %s54_s8 }
  0x3d   :  { %p577_p13 = scmp.ne.s32.totalorder %s54_s8, %s576_s17  ;;  %p582_p1 = scmp.lt.s32.totalorder %s576_s17, %s576_s17 }
  0x3f   :  { %p583_p2 = por %p582_p1, %p581_p0 }
  0x41   :  { %p584_p3 = pnand %p583_p2, %p577_p13 }
  0x43   :  { %587 = shalt.err (!%p584_p3)
}
  0x44   :  { %59 = dma.hbm_to_vmem [thread:$0]  %s756_s3, 1024, %s54_s8, [#allocation9], %s619_s28, %s619_s28, %s620_s29  }
  0x45   :  { %610 = dma.done.wait [#allocation3], 16  }
  0x46   :  { %611 = vsyncadd [#allocation3], 4294967280 }
  0x47   :  { %612 = dma.done.wait [#allocation6], 1216  }
  0x48   :  { %613 = vsyncadd [#allocation6], 4294966080 }
  0x49   :  { %614 = dma.done.wait [#allocation9], 1024  }
  0x4a   :  { %615 = vsyncadd [#allocation9], 4294966272  ;;  %v624_v0 = vmov 0.0   ;;  %vm625_vm0 = vmmov 0   ;;  %v482_v1 = vld [vmem:[#allocation5] sm:$0xff]   ;;  %vm97_vm1 = vcmask 1043456   ;;  %v80_v19 = vlaneseq }
  0x4b   :  { %425 = vmatprep.subr.bf16.mxu0 %v624_v0  ;;  %429 = vmatprep.mubr.msk.bf16.mxu0 %vm625_vm0, %v624_v0  ;;  %v483_v2 = vld [vmem:[#allocation5 + $0x8] ss:$0 sps:$4 sm:$0xff]   ;;  %v484_v3 = vld [vmem:[#allocation7] sm:$0xff]   ;;  %v485_v5 = vld [vmem:[#allocation7 + $0x8] sm:$0xff]   ;;  %vm93_vm2 = vcmask 195584  }
  0x4c   :  { %433 = vmatprep.subr.bf16.mxu1 %v624_v0  ;;  %449 = vmatprep.mubr.msk.bf16.mxu1 %vm625_vm0, %v624_v0  ;;  %v99_v4 = vsel %vm97_vm1, %v483_v2, 0  ;;  %v75_v6 = vld [vmem:[#allocation2] sm:$0x1]  ;;  %v487_v8 = vld [vmem:[#allocation7 + $0x18] sm:$0xff]   ;;  %v488_v9 = vld [vmem:[#allocation7 + $0x20] sm:$0xff]   ;;  %v81_v20 = vshrl.u32 %v80_v19, 7 }
  0x4d   :  { %426 = vmatpush3.bf16.msra.mxu0 %v482_v1  ;;  %434 = vmatpush3.bf16.msra.mxu1 %v484_v3  ;;  %v486_v7 = vld [vmem:[#allocation7 + $0x10] sm:$0xff]   ;;  %v489_v10 = vld [vmem:[#allocation7 + $0x28] sm:$0xff]   ;;  %v491_v12 = vld [vmem:[#allocation7 + $0x38] sm:$0xff]  }
  0x4e   :  { %427 = vmatprep.subr.bf16.mxu0 %v624_v0  ;;  %435 = vmatprep.subr.bf16.mxu1 %v624_v0  ;;  %v490_v11 = vld [vmem:[#allocation7 + $0x30] sm:$0xff]   ;;  %v492_v13 = vld [vmem:[#allocation8] sm:$0xff]   ;;  %v493_v14 = vld [vmem:[#allocation8 + $0x8] sm:$0xff]   ;;  %v82_v21 = vsub.s32 0, %v81_v20  ;;  %v162_v34 = vsub.s32 1, %v81_v20  ;;  %v274_v44 = vsub.s32 2, %v81_v20 }
  0x4f   :  { %v494_v15 = vld [vmem:[#allocation8 + $0x10] sm:$0xff]   ;;  %v495_v16 = vld [vmem:[#allocation8 + $0x18] sm:$0xff]   ;;  %v496_v17 = vld [vmem:[#allocation8 + $0x20] sm:$0xff]  }
  0x50   :  { %v497_v18 = vld [vmem:[#allocation8 + $0x28] sm:$0xff]   ;;  %v498_v32 = vld [vmem:[#allocation8 + $0x30] sm:$0xff]   ;;  %v499_v33 = vld [vmem:[#allocation8 + $0x38] sm:$0xff]  }
  0x51   :  { %428 = vmatpush3.bf16.msra.mxu0 %v99_v4  ;;  %436 = vmatpush3.bf16.msra.mxu1 %v485_v5  ;;  %v76_v22 = vld [vmem:[%s757_s4] sm:$0x7]  ;;  %s626_s4 = smov [#allocation10]  }
  0x52   :  { %453 = vmatprep.subr.bf16.mxu0 %v624_v0  ;;  %437 = vmatprep.subr.bf16.mxu1 %v624_v0  ;;  %v83_v23 = vrot.slane %v76_v22, %v82_v21  ;;  %v163_v35 = vrot.slane %v76_v22, %v162_v34  ;;  %v275_v45 = vrot.slane %v76_v22, %v274_v44  ;;  %s374_s29 = sshll.u32 %s626_s4, 4  ;;  %s375_s29 = int_to_ptr.vmem [resolvable:$true] %s374_s29 }
  0x53   :  { %s588_s1 = scalar_lea.vmem %s375_s29, 32  ;;  %p593_p5 = scmp.lt.s32.totalorder %s375_s29, %s375_s29 }
  0x54   :  { %430 = vmatmul.mubr.msk.bf16.vlgmr.msra.gmra.mrb[0].mxu0 %vm93_vm2, %v75_v6  ;;  %p589_p4 = scmp.ne.s32.totalorder %s375_s29, %s588_s1  ;;  %p594_p6 = scmp.lt.s32.totalorder %s588_s1, %s588_s1 }
  0x55   :  { %469 = vmatprep.mubr.msk.bf16.mxu0 %vm625_vm0, %v624_v0  ;;  %438 = vmatpush3.bf16.msra.mxu1 %v486_v7 }
  0x56   :  { %439 = vmatprep.subr.bf16.mxu1 %v624_v0  ;;  %454 = vmatpush3.bf16.msra.mxu0 %v492_v13  ;;  %p595_p7 = por %p594_p6, %p593_p5 }
  0x57   :  { %455 = vmatprep.subr.bf16.mxu0 %v624_v0 }
  0x58   :  { %p596_p8 = pnand %p595_p7, %p589_p4 }
  0x59   :  { %440 = vmatpush3.bf16.msra.mxu1 %v487_v8 }
  0x5a   :  { %441 = vmatprep.subr.bf16.mxu1 %v624_v0  ;;  %456 = vmatpush3.bf16.msra.mxu0 %v493_v14 }
  0x5b   :  { %457 = vmatprep.subr.bf16.mxu0 %v624_v0 }
  0x5d   :  { %442 = vmatpush3.bf16.msra.mxu1 %v488_v9 }
  0x5e   :  { %443 = vmatprep.subr.bf16.mxu1 %v624_v0  ;;  %458 = vmatpush3.bf16.msra.mxu0 %v494_v15 }
  0x5f   :  { %459 = vmatprep.subr.bf16.mxu0 %v624_v0 }
  0x61   :  { %444 = vmatpush3.bf16.msra.mxu1 %v489_v10 }
  0x62   :  { %445 = vmatprep.subr.bf16.mxu1 %v624_v0  ;;  %460 = vmatpush3.bf16.msra.mxu0 %v495_v16 }
  0x63   :  { %461 = vmatprep.subr.bf16.mxu0 %v624_v0 }
  0x65   :  { %446 = vmatpush3.bf16.msra.mxu1 %v490_v11 }
  0x66   :  { %447 = vmatprep.subr.bf16.mxu1 %v624_v0  ;;  %462 = vmatpush3.bf16.msra.mxu0 %v496_v17 }
  0x67   :  { %463 = vmatprep.subr.bf16.mxu0 %v624_v0 }
  0x69   :  { %448 = vmatpush3.bf16.msra.mxu1 %v491_v12 }
  0x6a   :  { %464 = vmatpush3.bf16.msra.mxu0 %v497_v18 }
  0x6b   :  { %465 = vmatprep.subr.bf16.mxu0 %v624_v0 }
  0x6e   :  { %466 = vmatpush3.bf16.msra.mxu0 %v498_v32 }
  0x6f   :  { %467 = vmatprep.subr.bf16.mxu0 %v624_v0 }
  0x72   :  { %468 = vmatpush3.bf16.msra.mxu0 %v499_v33 }
 0x127   :  { %v135_v24 = vpop.f32.mrb[0].mxu0 }
 0x128   :  { %v136_v25 = vadd.f32 %v135_v24, %v83_v23  ;;  %v431_v26 = vpop.f32.mrb[1].mxu0 }
 0x129   :  { %v138_v27 = vpop.f32.mrb[2].mxu0 }
 0x12a   :  { %v141_v28 = vmul.f32 0.2, %v136_v25  ;;  %v432_v29 = vpop.f32.mrb[3].mxu0 }
 0x12c   :  { %v142_v30 = vmax.f32 %v136_v25, %v141_v28 }
 0x12e   :  { %v143_v31 = vpack.c.bf16 %v142_v30, %v142_v30 }
 0x130   :  { %450 = vmatmul.mubr.bf16.vlgmr.msra.gmra.mrb[0].mxu1 %v143_v31 }
 0x203   :  { %v246_v36 = vpop.f32.mrb[0].mxu1 }
 0x204   :  { %v247_v37 = vadd.f32 %v246_v36, %v163_v35  ;;  %v451_v38 = vpop.f32.mrb[1].mxu1 }
 0x205   :  { %v249_v39 = vpop.f32.mrb[2].mxu1 }
 0x206   :  { %v252_v40 = vmul.f32 0.2, %v247_v37  ;;  %v452_v41 = vpop.f32.mrb[3].mxu1 }
 0x208   :  { %v253_v42 = vmax.f32 %v247_v37, %v252_v40 }
 0x20a   :  { %v255_v43 = vpack.c.bf16 %v253_v42, %v253_v42  ;;  %v254_v52 = vadd.f32 %v253_v42, %v142_v30 }
 0x20c   :  { %470 = vmatmul.mubr.bf16.vlgmr.msra.gmra.mrb[4].mxu0 %v255_v43 }
 0x2df   :  { %v358_v46 = vpop.f32.mrb[4].mxu0 }
 0x2e0   :  { %v359_v47 = vadd.f32 %v358_v46, %v275_v45  ;;  %v471_v48 = vpop.f32.mrb[5].mxu0 }
 0x2e1   :  { %v361_v49 = vpop.f32.mrb[6].mxu0 }
 0x2e2   :  { %v364_v50 = vmul.f32 0.2, %v359_v47  ;;  %v472_v51 = vpop.f32.mrb[7].mxu0 }
 0x2e4   :  { %v365_v53 = vmax.f32 %v359_v47, %v364_v50 }
 0x2e6   :  { %v366_v54 = vadd.f32 %v365_v53, %v254_v52 }
 0x2e8   :  { %367 = vst [vmem:[#allocation10] sm:$0x3] %v366_v54 }
 0x2e9   :  { %599 = shalt.err (!%p596_p8)
}
 0x2ea   :  { %s600_s20 = scalar_lea.hbm %s758_s5, 32 }
 0x2eb   :  { %p601_p9 = scmp.ne.s32.totalorder %s758_s5, %s600_s20  ;;  %p604_p10 = scmp.lt.u32.totalorder %s600_s20, %s758_s5 }
 0x2ed   :  { %p606_p11 = pnand %p604_p10, %p601_p9 }
 0x2ef   :  { %609 = shalt.err (!%p606_p11)
}
 0x2f0   :  { %377 = dma.vmem_to_hbm [thread:$0]  %s375_s29, 32, %s758_s5, [#allocation4]  }
 0x2f1   :  { %616 = dma.done.wait [#allocation4], 32  }
 0x2f2   :  { %617 = vsyncadd [#allocation4], 4294967264 }
 0x2f3   :  { %381 = vsyncpa [#allocation3], 1 }
 0x2f4   :  { %382 = vsyncpa [#allocation6], 1 }
 0x2f5   :  { %383 = vsyncpa [#allocation9], 1 }
 0x2f6   :  { %384 = vsyncpa [#allocation4], 1 }

</bundles_post_ra>
